<compile_context>
chip_gen: v7x
topology: tpu7x:2x2x1
jax: 0.10.0
libtpu: 0.0.40
codegen_flags: <defaults>
</compile_context>

<pallas_src>
import jax
import jax.numpy as jnp
import numpy as np
from jax.experimental import pallas as pl
from jax.experimental.pallas import tpu as pltpu


def _round_up8(n):
    return (n + 7) // 8 * 8


def _shift_layout(C1, C2):
    """Sublane-aligned offsets of the three shift vectors inside one tensor."""
    off1 = 0
    off2 = _round_up8(C1)
    off3 = off2 + _round_up8(C1)
    total = off3 + _round_up8(C2)
    return off1, off2, off3, total


def _make_kernel(W, L, C1, C2, off1, off2, off3):
    """Fused kernel for a fixed (image width W, lane extent L = B*HW)."""
    f32 = jnp.float32
    bf16 = jnp.bfloat16

    def kernel(x_ref, w1_ref, w2_ref, w3_ref, sh_ref, mask_ref, out_ref):
        x = x_ref[...]                                            # (C0, L) f32

        t1 = sh_ref[off1:off1 + C1, :]                            # (C1, 1) f32
        t2 = sh_ref[off2:off2 + C1, :]                            # (C1, 1) f32
        t3 = sh_ref[off3:off3 + C2, :]                            # (C2, 1) f32

        # ---- layer 1: 1x1 conv (BN scale pre-folded) + shift + ReLU --------
        y1 = jnp.dot(w1_ref[...], x.astype(bf16), preferred_element_type=f32)
        y1 = jnp.maximum(y1 + t1, 0.0)                            # (C1, L) f32

        # ---- layer 2: 3x3 conv, stride 1, pad 1 -----------------------------
        # 3 accumulated matmuls, one per row shift di; each contracts over the
        # 3 column-shifted taps (dj = -1,0,1).  Taps are lane rolls of y1 with
        # hoisted, precomputed edge masks (mask also kills cross-sample leaks).
        acc = None
        for r, di in enumerate((-1, 0, 1)):
            taps = []
            for c, dj in enumerate((-1, 0, 1)):
                k = 3 * r + c
                shift = (-(di * W + dj)) % L
                tap = y1 if shift == 0 else pltpu.roll(y1, shift=shift, axis=1)
                if di != 0 or dj != 0:
                    tap = tap * mask_ref[k:k + 1, :]              # f32 mask mult
                taps.append(tap)
            im_r = jnp.concatenate(taps, axis=0).astype(bf16)     # (3*C1, L)
            part = jnp.dot(w2_ref[r], im_r, preferred_element_type=f32)
            acc = part if acc is None else acc + part
        y2 = jnp.maximum(acc + t2, 0.0)                           # (C1, L) f32

        # ---- layer 3: 1x1 conv + shift + ReLU -------------------------------
        y3 = jnp.dot(w3_ref[...], y2.astype(bf16), preferred_element_type=f32)
        y3 = jnp.maximum(y3 + t3, 0.0)                            # (C2, L) f32

        # ---- residual add + final ReLU (f32, lane-dense store) --------------
        out_ref[...] = jnp.maximum(y3 + x, 0.0)

    return kernel


def resnet1_forward(x_nchw, kernel_params, num_steps=None):
    """NCHW in / NCHW out.  Per grid step the kernel sees (C, B*HW)."""
    w1k, w2k, w3k, shifts = kernel_params
    N, C0, H, W = x_nchw.shape
    C1 = w1k.shape[0]
    C2 = w3k.shape[0]
    assert C2 == C0, "residual add requires options[2] == options[0]"
    HW = H * W

    # Default: 2 parallel grid steps (keeps both v7x TCs busy, amortizes per-step
    # overhead).  On single-TC chips (v5e/v6e) num_steps=1 folds the whole batch.
    if num_steps is None:
        num_steps = 2 if (N >= 2 and N % 2 == 0) else 1
    assert N % num_steps == 0, "batch must divide evenly into grid steps"
    B = N // num_steps
    L = B * HW

    # Fold B samples onto the lane axis: (num_steps, C, B*HW).
    x = (x_nchw.astype(jnp.float32)
         .reshape(num_steps, B, C0, HW)
         .transpose(0, 2, 1, 3)
         .reshape(num_steps, C0, L))

    # Hoisted edge masks for the 9 taps.  Per-sample position = lane % HW, so
    # roll wrap-around across sample boundaries is zeroed as well.
    lane = np.arange(L)
    p = lane % HW
    col = p % W
    ones = np.ones(L, dtype=bool)
    row_ok = {-1: p >= W, 0: ones, 1: p < (H - 1) * W}
    col_ok = {-1: col >= 1, 0: ones, 1: col <= W - 2}
    masks = np.stack([(row_ok[di] & col_ok[dj]).astype(np.float32)
                      for di in (-1, 0, 1) for dj in (-1, 0, 1)])   # (9, L)
    masks = jnp.asarray(masks)

    off1, off2, off3, _ = _shift_layout(C1, C2)

    def full_spec(shp):
        nd = len(shp)
        return pl.BlockSpec(shp, lambda n: (0,) * nd)

    out = pl.pallas_call(
        _make_kernel(W, L, C1, C2, off1, off2, off3),
        out_shape=jax.ShapeDtypeStruct((num_steps, C2, L), jnp.float32),
        grid_spec=pltpu.PrefetchScalarGridSpec(
            num_scalar_prefetch=0,
            grid=(num_steps,),
            in_specs=[
                pl.BlockSpec((None, C0, L), lambda n: (n, 0, 0)),  # x (lane-dense)
                full_spec(w1k.shape),                              # (C1, C0)
                full_spec(w2k.shape),                              # (3, C1, 3*C1)
                full_spec(w3k.shape),                              # (C2, C1)
                full_spec(shifts.shape),                           # consolidated shifts
                full_spec(masks.shape),                            # (9, L) edge masks
            ],
            out_specs=pl.BlockSpec((None, C2, L), lambda n: (n, 0, 0)),
        ),
        compiler_params=pltpu.CompilerParams(
            dimension_semantics=("parallel",)),
    )(x, w1k, w2k, w3k, shifts, masks)

    return (out.reshape(num_steps, C2, B, HW)
               .transpose(0, 2, 1, 3)
               .reshape(N, C2, H, W))


def init_raw_params(key, C0, C1, C2):
    """Deterministic synthetic parameters (conv weights in HWIO / IO layout)."""
    ks = jax.random.split(key, 18)
    nrm, uni = jax.random.normal, jax.random.uniform
    w1 = 0.30 * nrm(ks[0], (C0, C1), jnp.float32)              # 1x1: (Cin, Cout)
    b1 = 0.10 * nrm(ks[1], (C1,), jnp.float32)
    w2 = 0.15 * nrm(ks[2], (3, 3, C1, C1), jnp.float32)        # 3x3: (kh, kw, Cin, Cout)
    b2 = 0.10 * nrm(ks[3], (C1,), jnp.float32)
    w3 = 0.30 * nrm(ks[4], (C1, C2), jnp.float32)
    b3 = 0.10 * nrm(ks[5], (C2,), jnp.float32)
    g1 = 1.0 + 0.1 * nrm(ks[6], (C1,), jnp.float32)
    be1 = 0.1 * nrm(ks[7], (C1,), jnp.float32)
    m1 = 0.1 * nrm(ks[8], (C1,), jnp.float32)
    v1 = uni(ks[9], (C1,), jnp.float32, minval=0.5, maxval=1.5)
    g2 = 1.0 + 0.1 * nrm(ks[10], (C1,), jnp.float32)
    be2 = 0.1 * nrm(ks[11], (C1,), jnp.float32)
    m2 = 0.1 * nrm(ks[12], (C1,), jnp.float32)
    v2 = uni(ks[13], (C1,), jnp.float32, minval=0.5, maxval=1.5)
    g3 = 1.0 + 0.1 * nrm(ks[14], (C2,), jnp.float32)
    be3 = 0.1 * nrm(ks[15], (C2,), jnp.float32)
    m3 = 0.1 * nrm(ks[16], (C2,), jnp.float32)
    v3 = uni(ks[17], (C2,), jnp.float32, minval=0.5, maxval=1.5)
    return (w1, b1, g1, be1, m1, v1, w2, b2, g2, be2, m2, v2,
            w3, b3, g3, be3, m3, v3)


def fold_kernel_params(raw, eps=1e-5):
    """Fold conv bias + eval-mode BN into bf16 scaled weights + one f32 shift tensor."""
    (w1, b1, g1, be1, m1, v1, w2, b2, g2, be2, m2, v2,
     w3, b3, g3, be3, m3, v3) = raw
    C0, C1 = w1.shape
    C2 = w3.shape[1]

    def fold(b, g, be, m, v):
        scale = g / jnp.sqrt(v + eps)
        shift = (b - m) * scale + be
        return scale, shift

    s1, t1 = fold(b1, g1, be1, m1, v1)
    s2, t2 = fold(b2, g2, be2, m2, v2)
    s3, t3 = fold(b3, g3, be3, m3, v3)

    w1k = (w1.T * s1[:, None]).astype(jnp.bfloat16)                    # (C1, C0)
    # (kh, kw, cin, cout) -> (kh, cout, kw, cin) -> (3, cout, 3*cin); scale per cout.
    w2k = (jnp.transpose(w2, (0, 3, 1, 2)).reshape(3, C1, 3 * C1)
           * s2[None, :, None]).astype(jnp.bfloat16)                   # (3, C1, 3*C1)
    w3k = (w3.T * s3[:, None]).astype(jnp.bfloat16)                    # (C2, C1)

    off1, off2, off3, total = _shift_layout(C1, C2)
    shifts = jnp.zeros((total, 1), jnp.float32)
    shifts = shifts.at[off1:off1 + C1, 0].set(t1.astype(jnp.float32))
    shifts = shifts.at[off2:off2 + C1, 0].set(t2.astype(jnp.float32))
    shifts = shifts.at[off3:off3 + C2, 0].set(t3.astype(jnp.float32))

    return (w1k, w2k, w3k, shifts)


def reference_forward(x_nhwc, raw, eps=1e-5):
    """Pure-JAX reference (un-folded BN math, f32 HIGHEST) for correctness."""
    (w1, b1, g1, be1, m1, v1, w2, b2, g2, be2, m2, v2,
     w3, b3, g3, be3, m3, v3) = raw
    hp = jax.lax.Precision.HIGHEST

    def conv(x, w, padding):
        return jax.lax.conv_general_dilated(
            x, w, window_strides=(1, 1), padding=padding,
            dimension_numbers=("NHWC", "HWIO", "NHWC"), precision=hp)

    def bn_relu(z, b, g, be, m, v):
        z = (z + b - m) / jnp.sqrt(v + eps) * g + be
        return jnp.maximum(z, 0.0)

    y = bn_relu(conv(x_nhwc, w1.reshape(1, 1, *w1.shape), [(0, 0), (0, 0)]),
                b1, g1, be1, m1, v1)
    y = bn_relu(conv(y, w2, [(1, 1), (1, 1)]), b2, g2, be2, m2, v2)
    y = bn_relu(conv(y, w3.reshape(1, 1, *w3.shape), [(0, 0), (0, 0)]),
                b3, g3, be3, m3, v3)
    return jnp.maximum(y + x_nhwc, 0.0)


if __name__ == "__main__":
    # options = [d0, d1, d2]; the residual add requires d2 == d0.
    options = [4, 8, 4]
    N, H, W = 2, 16, 16

    key = jax.random.PRNGKey(0)
    kx, kp = jax.random.split(key)
    x_nchw = jax.random.normal(kx, (N, options[0], H, W), jnp.float32)
    raw = init_raw_params(kp, *options)
    kparams = fold_kernel_params(raw)

    # Pure-JAX reference (un-folded BN, f32) for correctness.
    x_nhwc = jnp.transpose(x_nchw, (0, 2, 3, 1))
    ref = np.asarray(jnp.transpose(reference_forward(x_nhwc, raw), (0, 3, 1, 2)))

    # Default path: 2 parallel grid steps (v7x megacore friendly).
    out2 = jax.block_until_ready(resnet1_forward(x_nchw, kparams))
    np.testing.assert_allclose(np.asarray(out2), ref, rtol=2e-2, atol=2e-2)

    # Single-step path: whole batch folded onto the lane axis (tests the
    # per-sample (lane % HW) edge masks across sample boundaries).
    out1 = jax.block_until_ready(resnet1_forward(x_nchw, kparams, num_steps=1))
    np.testing.assert_allclose(np.asarray(out1), ref, rtol=2e-2, atol=2e-2)

    print("KERNEL_OK")
</pallas_src>

<mosaic_0001>
module attributes {stable_mosaic.version = 11 : i64} {
  func.func @kernel(%arg0: i32, %arg1: memref<1x4x256xf32, #tpu.memory_space<vmem>>, %arg2: memref<8x4xbf16, #tpu.memory_space<vmem>>, %arg3: memref<3x8x24xbf16, #tpu.memory_space<vmem>>, %arg4: memref<4x8xbf16, #tpu.memory_space<vmem>>, %arg5: memref<24x1xf32, #tpu.memory_space<vmem>>, %arg6: memref<9x256xf32, #tpu.memory_space<vmem>>, %arg7: memref<1x4x256xf32, #tpu.memory_space<vmem>>) attributes {dimension_semantics = [#tpu.dimension_semantics<parallel>], iteration_bounds = array<i64: 2>, scalar_prefetch = 0 : i64, scratch_operands = 0 : i64, tpu.core_type = #tpu.core_type<tc>, window_params = [{transform_indices = @transform_0, window_bounds = array<i64: 1, 4, 256>}, {pipeline_mode = #tpu.pipeline_mode<synchronous>, transform_indices = @transform_1, window_bounds = array<i64: 8, 4>}, {pipeline_mode = #tpu.pipeline_mode<synchronous>, transform_indices = @transform_2, window_bounds = array<i64: 3, 8, 24>}, {pipeline_mode = #tpu.pipeline_mode<synchronous>, transform_indices = @transform_3, window_bounds = array<i64: 4, 8>}, {pipeline_mode = #tpu.pipeline_mode<synchronous>, transform_indices = @transform_4, window_bounds = array<i64: 24, 1>}, {pipeline_mode = #tpu.pipeline_mode<synchronous>, transform_indices = @transform_5, window_bounds = array<i64: 9, 256>}, {transform_indices = @transform_6, window_bounds = array<i64: 1, 4, 256>}]} {
    %c0 = arith.constant 0 : index
    %c0_0 = arith.constant 0 : index
    %c0_1 = arith.constant 0 : index
    %0 = vector.load %arg1[%c0, %c0_0, %c0_1] : memref<1x4x256xf32, #tpu.memory_space<vmem>>, vector<1x4x256xf32>
    %1 = vector.shape_cast %0 : vector<1x4x256xf32> to vector<4x256xf32>
    %c0_2 = arith.constant 0 : index
    %c0_3 = arith.constant 0 : index
    %2 = vector.load %arg5[%c0_2, %c0_3] : memref<24x1xf32, #tpu.memory_space<vmem>>, vector<8x1xf32>
    %c8 = arith.constant 8 : index
    %c0_4 = arith.constant 0 : index
    %3 = vector.load %arg5[%c8, %c0_4] : memref<24x1xf32, #tpu.memory_space<vmem>>, vector<8x1xf32>
    %c16 = arith.constant 16 : index
    %c0_5 = arith.constant 0 : index
    %4 = vector.load %arg5[%c16, %c0_5] : memref<24x1xf32, #tpu.memory_space<vmem>>, vector<4x1xf32>
    %c0_6 = arith.constant 0 : index
    %c0_7 = arith.constant 0 : index
    %5 = vector.load %arg2[%c0_6, %c0_7] : memref<8x4xbf16, #tpu.memory_space<vmem>>, vector<8x4xbf16>
    %6 = arith.truncf %1 : vector<4x256xf32> to vector<4x256xbf16>
    %cst = arith.constant dense<0.000000e+00> : vector<8x256xf32>
    %7 = tpu.matmul %5, %6, %cst {dimension_numbers = #tpu.dot_dimension_numbers<[1], [0], [0], [1], [0, 0, 1, 1], [], []>} : vector<8x4xbf16>, vector<4x256xbf16>, vector<8x256xf32> -> vector<8x256xf32>
    %8 = vector.broadcast %2 : vector<8x1xf32> to vector<8x256xf32>
    %9 = arith.addf %7, %8 : vector<8x256xf32>
    %cst_8 = arith.constant 0.000000e+00 : f32
    %10 = vector.broadcast %cst_8 : f32 to vector<8x256xf32>
    %11 = arith.maximumf %9, %10 : vector<8x256xf32>
    %c17_i32 = arith.constant 17 : i32
    %12 = tpu.dynamic_rotate %11 by %c17_i32 dim 1 : vector<8x256xf32>, i32 -> vector<8x256xf32>
    %c0_9 = arith.constant 0 : index
    %c0_10 = arith.constant 0 : index
    %13 = vector.load %arg6[%c0_9, %c0_10] : memref<9x256xf32, #tpu.memory_space<vmem>>, vector<1x256xf32>
    %14 = vector.broadcast %13 : vector<1x256xf32> to vector<8x256xf32>
    %15 = arith.mulf %12, %14 : vector<8x256xf32>
    %c16_i32 = arith.constant 16 : i32
    %16 = tpu.dynamic_rotate %11 by %c16_i32 dim 1 : vector<8x256xf32>, i32 -> vector<8x256xf32>
    %c1 = arith.constant 1 : index
    %c0_11 = arith.constant 0 : index
    %17 = vector.load %arg6[%c1, %c0_11] : memref<9x256xf32, #tpu.memory_space<vmem>>, vector<1x256xf32>
    %18 = vector.broadcast %17 : vector<1x256xf32> to vector<8x256xf32>
    %19 = arith.mulf %16, %18 : vector<8x256xf32>
    %c15_i32 = arith.constant 15 : i32
    %20 = tpu.dynamic_rotate %11 by %c15_i32 dim 1 : vector<8x256xf32>, i32 -> vector<8x256xf32>
    %c2 = arith.constant 2 : index
    %c0_12 = arith.constant 0 : index
    %21 = vector.load %arg6[%c2, %c0_12] : memref<9x256xf32, #tpu.memory_space<vmem>>, vector<1x256xf32>
    %22 = vector.broadcast %21 : vector<1x256xf32> to vector<8x256xf32>
    %23 = arith.mulf %20, %22 : vector<8x256xf32>
    %24 = tpu.concatenate %15, %19, %23 in 0 : vector<8x256xf32>, vector<8x256xf32>, vector<8x256xf32> -> vector<24x256xf32>
    %25 = arith.truncf %24 : vector<24x256xf32> to vector<24x256xbf16>
    %c0_13 = arith.constant 0 : index
    %c0_14 = arith.constant 0 : index
    %c0_15 = arith.constant 0 : index
    %26 = vector.load %arg3[%c0_13, %c0_14, %c0_15] : memref<3x8x24xbf16, #tpu.memory_space<vmem>>, vector<1x8x24xbf16>
    %27 = vector.shape_cast %26 : vector<1x8x24xbf16> to vector<8x24xbf16>
    %cst_16 = arith.constant dense<0.000000e+00> : vector<8x256xf32>
    %28 = tpu.matmul %27, %25, %cst_16 {dimension_numbers = #tpu.dot_dimension_numbers<[1], [0], [0], [1], [0, 0, 1, 1], [], []>} : vector<8x24xbf16>, vector<24x256xbf16>, vector<8x256xf32> -> vector<8x256xf32>
    %c1_i32 = arith.constant 1 : i32
    %29 = tpu.dynamic_rotate %11 by %c1_i32 dim 1 : vector<8x256xf32>, i32 -> vector<8x256xf32>
    %c3 = arith.constant 3 : index
    %c0_17 = arith.constant 0 : index
    %30 = vector.load %arg6[%c3, %c0_17] : memref<9x256xf32, #tpu.memory_space<vmem>>, vector<1x256xf32>
    %31 = vector.broadcast %30 : vector<1x256xf32> to vector<8x256xf32>
    %32 = arith.mulf %29, %31 : vector<8x256xf32>
    %c255_i32 = arith.constant 255 : i32
    %33 = tpu.dynamic_rotate %11 by %c255_i32 dim 1 : vector<8x256xf32>, i32 -> vector<8x256xf32>
    %c5 = arith.constant 5 : index
    %c0_18 = arith.constant 0 : index
    %34 = vector.load %arg6[%c5, %c0_18] : memref<9x256xf32, #tpu.memory_space<vmem>>, vector<1x256xf32>
    %35 = vector.broadcast %34 : vector<1x256xf32> to vector<8x256xf32>
    %36 = arith.mulf %33, %35 : vector<8x256xf32>
    %37 = tpu.concatenate %32, %11, %36 in 0 : vector<8x256xf32>, vector<8x256xf32>, vector<8x256xf32> -> vector<24x256xf32>
    %38 = arith.truncf %37 : vector<24x256xf32> to vector<24x256xbf16>
    %c1_19 = arith.constant 1 : index
    %c0_20 = arith.constant 0 : index
    %c0_21 = arith.constant 0 : index
    %39 = vector.load %arg3[%c1_19, %c0_20, %c0_21] : memref<3x8x24xbf16, #tpu.memory_space<vmem>>, vector<1x8x24xbf16>
    %40 = vector.shape_cast %39 : vector<1x8x24xbf16> to vector<8x24xbf16>
    %cst_22 = arith.constant dense<0.000000e+00> : vector<8x256xf32>
    %41 = tpu.matmul %40, %38, %cst_22 {dimension_numbers = #tpu.dot_dimension_numbers<[1], [0], [0], [1], [0, 0, 1, 1], [], []>} : vector<8x24xbf16>, vector<24x256xbf16>, vector<8x256xf32> -> vector<8x256xf32>
    %42 = arith.addf %28, %41 : vector<8x256xf32>
    %c241_i32 = arith.constant 241 : i32
    %43 = tpu.dynamic_rotate %11 by %c241_i32 dim 1 : vector<8x256xf32>, i32 -> vector<8x256xf32>
    %c6 = arith.constant 6 : index
    %c0_23 = arith.constant 0 : index
    %44 = vector.load %arg6[%c6, %c0_23] : memref<9x256xf32, #tpu.memory_space<vmem>>, vector<1x256xf32>
    %45 = vector.broadcast %44 : vector<1x256xf32> to vector<8x256xf32>
    %46 = arith.mulf %43, %45 : vector<8x256xf32>
    %c240_i32 = arith.constant 240 : i32
    %47 = tpu.dynamic_rotate %11 by %c240_i32 dim 1 : vector<8x256xf32>, i32 -> vector<8x256xf32>
    %c7 = arith.constant 7 : index
    %c0_24 = arith.constant 0 : index
    %48 = vector.load %arg6[%c7, %c0_24] : memref<9x256xf32, #tpu.memory_space<vmem>>, vector<1x256xf32>
    %49 = vector.broadcast %48 : vector<1x256xf32> to vector<8x256xf32>
    %50 = arith.mulf %47, %49 : vector<8x256xf32>
    %c239_i32 = arith.constant 239 : i32
    %51 = tpu.dynamic_rotate %11 by %c239_i32 dim 1 : vector<8x256xf32>, i32 -> vector<8x256xf32>
    %c8_25 = arith.constant 8 : index
    %c0_26 = arith.constant 0 : index
    %52 = vector.load %arg6[%c8_25, %c0_26] : memref<9x256xf32, #tpu.memory_space<vmem>>, vector<1x256xf32>
    %53 = vector.broadcast %52 : vector<1x256xf32> to vector<8x256xf32>
    %54 = arith.mulf %51, %53 : vector<8x256xf32>
    %55 = tpu.concatenate %46, %50, %54 in 0 : vector<8x256xf32>, vector<8x256xf32>, vector<8x256xf32> -> vector<24x256xf32>
    %56 = arith.truncf %55 : vector<24x256xf32> to vector<24x256xbf16>
    %c2_27 = arith.constant 2 : index
    %c0_28 = arith.constant 0 : index
    %c0_29 = arith.constant 0 : index
    %57 = vector.load %arg3[%c2_27, %c0_28, %c0_29] : memref<3x8x24xbf16, #tpu.memory_space<vmem>>, vector<1x8x24xbf16>
    %58 = vector.shape_cast %57 : vector<1x8x24xbf16> to vector<8x24xbf16>
    %cst_30 = arith.constant dense<0.000000e+00> : vector<8x256xf32>
    %59 = tpu.matmul %58, %56, %cst_30 {dimension_numbers = #tpu.dot_dimension_numbers<[1], [0], [0], [1], [0, 0, 1, 1], [], []>} : vector<8x24xbf16>, vector<24x256xbf16>, vector<8x256xf32> -> vector<8x256xf32>
    %60 = arith.addf %42, %59 : vector<8x256xf32>
    %61 = vector.broadcast %3 : vector<8x1xf32> to vector<8x256xf32>
    %62 = arith.addf %60, %61 : vector<8x256xf32>
    %cst_31 = arith.constant 0.000000e+00 : f32
    %63 = vector.broadcast %cst_31 : f32 to vector<8x256xf32>
    %64 = arith.maximumf %62, %63 : vector<8x256xf32>
    %c0_32 = arith.constant 0 : index
    %c0_33 = arith.constant 0 : index
    %65 = vector.load %arg4[%c0_32, %c0_33] : memref<4x8xbf16, #tpu.memory_space<vmem>>, vector<4x8xbf16>
    %66 = arith.truncf %64 : vector<8x256xf32> to vector<8x256xbf16>
    %cst_34 = arith.constant dense<0.000000e+00> : vector<4x256xf32>
    %67 = tpu.matmul %65, %66, %cst_34 {dimension_numbers = #tpu.dot_dimension_numbers<[1], [0], [0], [1], [0, 0, 1, 1], [], []>} : vector<4x8xbf16>, vector<8x256xbf16>, vector<4x256xf32> -> vector<4x256xf32>
    %68 = vector.broadcast %4 : vector<4x1xf32> to vector<4x256xf32>
    %69 = arith.addf %67, %68 : vector<4x256xf32>
    %cst_35 = arith.constant 0.000000e+00 : f32
    %70 = vector.broadcast %cst_35 : f32 to vector<4x256xf32>
    %71 = arith.maximumf %69, %70 : vector<4x256xf32>
    %72 = arith.addf %71, %1 : vector<4x256xf32>
    %cst_36 = arith.constant 0.000000e+00 : f32
    %73 = vector.broadcast %cst_36 : f32 to vector<4x256xf32>
    %74 = arith.maximumf %72, %73 : vector<4x256xf32>
    %c0_37 = arith.constant 0 : index
    %c0_38 = arith.constant 0 : index
    %c0_39 = arith.constant 0 : index
    %75 = vector.load %arg7[%c0_37, %c0_38, %c0_39] : memref<1x4x256xf32, #tpu.memory_space<vmem>>, vector<1x4x256xf32>
    %76 = vector.shape_cast %75 : vector<1x4x256xf32> to vector<4x256xf32>
    %77 = vector.shape_cast %74 : vector<4x256xf32> to vector<1x4x256xf32>
    tpu.vector_store %arg7[%c0_37, %c0_38, %c0_39], %77 {strides = array<i32>} : memref<1x4x256xf32, #tpu.memory_space<vmem>>, vector<1x4x256xf32>,
    return
  }
  func.func @transform_0(%arg0: i32) -> (i32, i32, i32) {
    %c0_i32 = arith.constant 0 : i32
    %c0_i32_0 = arith.constant 0 : i32
    %c0_i32_1 = arith.constant 0 : i32
    return %arg0, %c0_i32, %c0_i32_0 : i32, i32, i32
  }
  func.func @transform_1(%arg0: i32) -> (i32, i32) {
    %c0_i32 = arith.constant 0 : i32
    %c0_i32_0 = arith.constant 0 : i32
    %c0_i32_1 = arith.constant 0 : i32
    return %c0_i32, %c0_i32_0 : i32, i32
  }
  func.func @transform_2(%arg0: i32) -> (i32, i32, i32) {
    %c0_i32 = arith.constant 0 : i32
    %c0_i32_0 = arith.constant 0 : i32
    %c0_i32_1 = arith.constant 0 : i32
    %c0_i32_2 = arith.constant 0 : i32
    return %c0_i32, %c0_i32_0, %c0_i32_1 : i32, i32, i32
  }
  func.func @transform_3(%arg0: i32) -> (i32, i32) {
    %c0_i32 = arith.constant 0 : i32
    %c0_i32_0 = arith.constant 0 : i32
    %c0_i32_1 = arith.constant 0 : i32
    return %c0_i32, %c0_i32_0 : i32, i32
  }
  func.func @transform_4(%arg0: i32) -> (i32, i32) {
    %c0_i32 = arith.constant 0 : i32
    %c0_i32_0 = arith.constant 0 : i32
    %c0_i32_1 = arith.constant 0 : i32
    return %c0_i32, %c0_i32_0 : i32, i32
  }
  func.func @transform_5(%arg0: i32) -> (i32, i32) {
    %c0_i32 = arith.constant 0 : i32
    %c0_i32_0 = arith.constant 0 : i32
    %c0_i32_1 = arith.constant 0 : i32
    return %c0_i32, %c0_i32_0 : i32, i32
  }
  func.func @transform_6(%arg0: i32) -> (i32, i32, i32) {
    %c0_i32 = arith.constant 0 : i32
    %c0_i32_0 = arith.constant 0 : i32
    %c0_i32_1 = arith.constant 0 : i32
    return %arg0, %c0_i32, %c0_i32_0 : i32, i32, i32
  }
}

</mosaic_0001>

<bundles_post_ra>
// kernel: tpu_custom_call.1
= control target key start
LH: loop header
LB: loop body
LE: loop exit
PB: predicated region body
PF: predicated region fallthrough
CT: control target
= control target key end

     0   :  { %11 = vsyncpa [#allocation3], 0  ;;  %s1471_s0 = inlined_call_operand.vmem [shape: f32[2,4,256], index: 0, kind: input, shape index: {}]   ;;  %s1472_s1 = inlined_call_operand.vmem [shape: bf16[8,4], index: 1, kind: input, shape index: {}]   ;;  %s1473_s2 = inlined_call_operand.hbm [shape: bf16[3,8,24], index: 2, kind: input, shape index: {}]   ;;  %s1474_s3 = inlined_call_operand.hbm [shape: bf16[4,8], index: 3, kind: input, shape index: {}]   ;;  %s1475_s4 = inlined_call_operand.vmem [shape: f32[24,1], index: 4, kind: input, shape index: {}]   ;;  %s1476_s5 = inlined_call_operand.vmem [shape: f32[9,256], index: 5, kind: input, shape index: {}]   ;;  %s1477_s6 = inlined_call_operand.hbm [shape: f32[2,4,256], index: 6, kind: output, shape index: {}]  }
   0x1   :  { %12 = vsyncpa [#allocation6], 0 }
   0x2   :  { %13 = vsyncpa [#allocation4], 0 }
   0x3   :  { %15 = vsyncpa [#allocation4 + $0x1], 0  ;;  %s1157_s21 = smov 0   ;;  %s1159_s22 = smov 0  }
   0x4   :  { %s1161_s23 = smov 0   ;;  %s1163_s24 = smov 0  }
   0x5 LB: > { %s1178_s25 = sadd.s32 4294967295, %s1106_s24   ;;  %s871_s26 = sadd.s32 4294967294, %s1106_s24   ;;  %s1106_s24 = sphi %s1163_s24, %s1495_s24   ;;  %s1102_s23 = sphi %s1161_s23, %s1494_s23   ;;  %s1098_s22 = sphi %s1159_s22, %s1493_s22   ;;  %s1094_s21 = sphi %s1157_s21, %s1492_s21  }
   0x6   : > { %s1182_s27 = sadd.s32 1, %s1106_s24   ;;  %s159_s28 = sadd.s32 1, %s1102_s23 }
   0x7   : > { %s156_s29 = ssub.s32 %s1106_s24, %s1182_s27  ;;  %p169_p0 = scmp.ne.s32.totalorder %s1102_s23, %s1098_s22 }
   0x8   : > { %p157_p1 = scmp.eq.s32.totalorder %s156_s29, 0  ;;  %p170_p2 = scmp.eq.s32.totalorder %s1178_s25, 1 }
   0x9   : > { %p175_p3 = scmp.ne.s32.totalorder %s1098_s22, %s1094_s21  ;;  %p176_p4 = scmp.eq.s32.totalorder %s871_s26, 1 }
   0xa   : > { %s1193_s30 = scalar_select %p157_p1, %s1102_s23, %s159_s28  }
   0xb   : > { %p1195_p5 = por %p170_p2, %p169_p0  ;;  %p1199_p6 = por %p176_p4, %p175_p3 }
   0xc   : > { %p872_p7 = scmp.ge.s32.totalorder %s1106_s24, 1  ;;  %p183_p8 = scmp.lt.s32.totalorder %s1106_s24, 3 }
   0xd   : > { %s1481_s7 = scalar_select %p1195_p5, 1, 0 }
   0xe   : > { %s1482_s8 = scalar_select %p1199_p6, 1, 0 }
   0xf   : > { %p1478_p9 = scmp.eq.s32.totalorder %s1178_s25, 0  ;;  %p1206_p10 = pnand %p872_p7, %p183_p8 }
  0x10   : > { %s1108_s10 = smov [#allocation2]   ;;  %s1109_s13 = smov [#allocation5]  }
  0x11   : > { %s1483_s9 = scalar_select %p1206_p10, 1, 0 }
  0x12   : > { %s198_s11 = sshll.u32 %s1108_s10, 4  ;;  %p916_p11 = pneg %p1206_p10  ;;  %s199_s11 = int_to_ptr.vmem [resolvable:$true] %s198_s11 }
  0x13   : > { %s212_s14 = sshll.u32 %s1109_s13, 4  ;;  %s980_s17 = scalar_lea.hbm %s1473_s2, 192  ;;  %s1218_s14 = int_to_ptr.vmem [resolvable:$true] %s212_s14 }
  0x14   : > { %p1214_p12 = pnand %p1478_p9, %p916_p11  ;;  %p981_p13 = scmp.ne.s32.totalorder %s1473_s2, %s980_s17 }
  0x15   : > { %p987_p3 = scmp.lt.u32.totalorder %s980_s17, %s1473_s2 }
  0x16   : > { %p982_p0 = pneg %p1214_p12 }
  0x18   : > { %p983_p1 = pnand %p982_p0, %p981_p13 }
  0x1a   : > { %p984_p2 = pneg %p983_p1 }
  0x1c   : > { %p989_p4 = pnand %p987_p3, %p984_p2 }
  0x1e   : > { %992 = shalt.err (!%p989_p4)
}
  0x1f   : > { %s993_s28 = scalar_lea.vmem %s199_s11, 192  ;;  %p1001_p9 = scmp.lt.s32.totalorder %s199_s11, %s199_s11 }
  0x20   : > { %p994_p7 = scmp.ne.s32.totalorder %s199_s11, %s993_s28  ;;  %p1002_p6 = scmp.lt.s32.totalorder %s993_s28, %s993_s28 }
  0x22   : > { %p996_p8 = pnand %p994_p7, %p982_p0  ;;  %p1003_p5 = por %p1002_p6, %p1001_p9 }
  0x24   : > { %p997_p11 = pneg %p996_p8 }
  0x26   : > { %p1004_p10 = pnand %p1003_p5, %p997_p11 }
  0x28   : > { %1007 = shalt.err (!%p1004_p10)
}
  0x29   : > { %s1110_s29 = smov 64   ;;  %s1111_s10 = smov 4  }
  0x2a   : > { %919 = dma.hbm_to_vmem [thread:$0]  (!%p1214_p12), %s1473_s2, 192, %s199_s11, [#allocation3], %s1110_s29, %s1110_s29, %s1111_s10  }
  0x2b   : > { %s1008_s18 = scalar_lea.hbm %s1474_s3, 32 }
  0x2c   : > { %p1009_p13 = scmp.ne.s32.totalorder %s1474_s3, %s1008_s18  ;;  %p1015_p9 = scmp.lt.u32.totalorder %s1008_s18, %s1474_s3 }
  0x2e   : > { %p1011_p5 = pnand %p1009_p13, %p982_p0 }
  0x30   : > { %p1012_p6 = pneg %p1011_p5 }
  0x32   : > { %p1017_p10 = pnand %p1015_p9, %p1012_p6 }
  0x34   : > { %1020 = shalt.err (!%p1017_p10)
}
  0x35   : > { %s1021_s11 = scalar_lea.vmem %s1218_s14, 32  ;;  %p1029_p4 = scmp.lt.s32.totalorder %s1218_s14, %s1218_s14 }
  0x36   : > { %p1022_p1 = scmp.ne.s32.totalorder %s1218_s14, %s1021_s11  ;;  %p1030_p7 = scmp.lt.s32.totalorder %s1021_s11, %s1021_s11 }
  0x38   : > { %p1024_p2 = pnand %p1022_p1, %p982_p0  ;;  %p1031_p8 = por %p1030_p7, %p1029_p4 }
  0x3a   : > { %p1025_p3 = pneg %p1024_p2 }
  0x3c   : > { %p1032_p11 = pnand %p1031_p8, %p1025_p3 }
  0x3e   : > { %1035 = shalt.err (!%p1032_p11)
}
  0x3f   : > { %922 = dma.hbm_to_vmem [thread:$0]  (!%p1214_p12), %s1474_s3, 32, %s1218_s14, [#allocation6]  }
  0x40   : > { %p1485_p13 = scmp.ne.s32.totalorder %s1483_s9, 0 }
  0x41   : > { %p1486_p5 = scmp.eq.s32.totalorder (!%p1485_p13), %s1178_s25, 0 }
  0x42   : > { %239 = sbr.rel (%p1485_p13) target bundleno = 923 (0x39b), region = 44 }
  0x49   : > { %1081 = dma.done.wait (%p1486_p5), [#allocation3], 192   ;;  %p1487_p0 = pmov %p1486_p5 }
  0x4b   : > { %1083 = vsyncadd (%p1487_p0), [#allocation3], 4294967104  ;;  %p1488_p6 = pmov %p1487_p0 }
  0x4c   : > { %p1489_p9 = pmov %p1487_p0 }
  0x4d   : > { %1085 = dma.done.wait (%p1488_p6), [#allocation6], 32  }
  0x4e   : > { %1087 = vsyncadd (%p1489_p9), [#allocation6], 4294967264  ;;  %p273_p10 = scmp.lt.s32.totalorder %s1178_s25, 1  ;;  %v1112_v0 = vmov 0   ;;  %vm298_vm0 = vcmask 1041408   ;;  %v280_v2 = vld [vmem:[%s1475_s4] sm:$0xff]  ;;  %v352_v19 = vlaneseq }
  0x4f   : > { %337 = vmatprep.mubr.bf16.mxu0 %v1112_v0  ;;  %977 = vset.pattern.permute.xlu0 %v1112_v0  ;;  %v283_v7 = vld [vmem:[%s1472_s1] sm:$0xf]  ;;  %vm294_vm1 = vcmask 31744   ;;  %s1113_s20 = smov 127   ;;  %s1114_s26 = smov 1   ;;  %v281_v18 = vld [vmem:[%s1475_s4 + $0x8] sm:$0xff] }
  0x50   : > { %s274_s9 = scalar_select %p273_p10, %s1178_s25, 1  ;;  %513 = vmatprep.mubr.bf16.mxu1 %v1112_v0  ;;  %978 = vset.pattern.permute.xlu1 %v1112_v0  ;;  %v282_v17 = vld [vmem:[%s1475_s4 + $0x10] sm:$0xf]  ;;  %v360_v22 = vshrl.u32 %v352_v19, 7  ;;  %v1329_v25 = vand.u32 127, %v352_v19  ;;  %vm474_vm9 = vcmask 1043456  }
  0x51   : > { %291 = vperm.xlu0 %977, %v280_v2   ;;  %s1115_s28 = smov 17   ;;  %s1116_s11 = smov 16   ;;  %v357_v26 = vld [vmem:[%s1476_s5] ss:$8 sm:$0x3]  ;;  %vm470_vm11 = vcmask 195584  }
  0x52   : > { %s904_s12 = sshll.u32 %s274_s9, 3  ;;  %s1117_s29 = smov 113   ;;  %v1334_v27 = vsub.s32 0, %v360_v22  ;;  %v884_v28 = vld [vmem:[%s1476_s5 + $0x1] ss:$8 sm:$0x3] }
  0x53   : > { %s277_s15 = scalar_lea.vmem %s1471_s0, %s904_s12  ;;  %s1118_s10 = smov 112   ;;  %v1339_v29 = vsub.s32 1, %v360_v22  ;;  %vm354_vm2 = vcmp.lt.s32.totalorder %v1329_v25, 17  ;;  %v887_v32 = vld [vmem:[%s1476_s5 + $0x5] ss:$8 sm:$0x3] }
  0x54   : > { %v1286_v1 = vld [vmem:[%s277_s15] sm:$0xff]  ;;  %s1119_s9 = smov 15   ;;  %s1120_s12 = smov 111   ;;  %v362_v33 = vrot.slane %v357_v26, %v1334_v27  ;;  %vm375_vm3 = vcmp.lt.s32.totalorder %v1329_v25, 16  ;;  %v384_v35 = vrot.slane %v884_v28, %v1334_v27  ;;  %vm446_vm4 = vcmp.lt.s32.totalorder %v1329_v25, 127 }
  0x55   : > { %v1293_v3 = vcombine.high %v1286_v1, %v1286_v1  ;;  %v287_v4 = vpack.c.bf16 %v1286_v1, %v1286_v1  ;;  %v366_v34 = vrot.slane %v357_v26, %v1339_v29  ;;  %v388_v36 = vrot.slane %v884_v28, %v1339_v29  ;;  %v886_v37 = vld [vmem:[%s1476_s5 + $0x3] ss:$8 sm:$0x3]  ;;  %v893_v52 = vld [vmem:[%s1476_s5 + $0x7] ss:$8 sm:$0x3] }
  0x56   : > { %v455_v40 = vrot.slane %v887_v32, %v1334_v27  ;;  %v459_v41 = vrot.slane %v887_v32, %v1339_v29  ;;  %vm424_vm5 = vcmp.lt.s32.totalorder %v1329_v25, 1  ;;  %v433_v46 = vrot.slane %v886_v37, %v1334_v27  ;;  %v892_v57 = vld [vmem:[%s1476_s5 + $0x6] ss:$8 sm:$0x3]  ;;  %s270_s18 = sand.u32 1, %s1098_s22   ;;  %p1490_p1 = scmp.ne.s32.totalorder %s1481_s7, 0 }
  0x57   : > { %v288_v5 = vpack.c.bf16 %v1293_v3, %v1293_v3  ;;  %v300_v6 = vsel %vm298_vm0, %v287_v4, 0  ;;  %v437_v47 = vrot.slane %v886_v37, %v1339_v29  ;;  %vm576_vm6 = vcmp.lt.s32.totalorder %v1329_v25, 113  ;;  %v894_v19 = vld [vmem:[%s1476_s5 + $0x10] ss:$8 sm:$0x3]  ;;  %s879_s19 = sshll.u32 %s270_s18, 3 }
  0x58   : > { %vm598_vm7 = vcmp.lt.s32.totalorder %v1329_v25, 112  ;;  %v611_v62 = vrot.slane %v893_v52, %v1339_v29  ;;  %vm397_vm8 = vcmp.lt.s32.totalorder %v1329_v25, 15  ;;  %v585_v22 = vrot.slane %v892_v57, %v1334_v27 }
  0x59   : > { %882 = vmatprep.subr.msk.bf16.mxu0 %vm298_vm0, %v288_v5  ;;  %vm620_vm10 = vcmp.lt.s32.totalorder %v1329_v25, 111  ;;  %vm713_vm12 = vcmask 64512  }
  0x5a   : > { %306 = vmatpush1.bf16.msra.mxu0 %v300_v6  ;;  %v885_v6 = vld [vmem:[%s1476_s5 + $0x2] ss:$8 sm:$0x3] }
  0x5d   : > { %883 = vmatmul.mubr.msk.bf16.vlgmr.msra.gmra.mrb[0].mxu0 %vm294_vm1, %v283_v7  ;;  %v589_v7 = vrot.slane %v892_v57, %v1339_v29 }
  0x5e   : > { %563 = vmatprep.mubr.bf16.mxu0 %v1112_v0 }
  0xd0   : > { %v292_v8 = vpop.permute.xlu0 %291 }
 0x130   : > { %v339_v9 = vpop.f32.mrb[0].mxu0 }
 0x131   : > { %v340_v10 = vadd.f32 %v339_v9, %v292_v8  ;;  %v341_v11 = vpop.f32.mrb[1].mxu0  ;;  %v607_v9 = vrot.slane %v893_v52, %v1334_v27  ;;  %v643_v52 = vld [vmem:[#allocation2 + $0x8] sm:$0xf] }
 0x132   : > { %v343_v12 = vpop.f32.mrb[2].mxu0  ;;  %v342_v14 = vadd.f32 %v341_v11, %v292_v8 }
 0x133   : > { %v1303_v13 = vmax.f32 %v340_v10, 0.0  ;;  %v344_v15 = vpop.f32.mrb[3].mxu0 }
 0x134   : > { %v1307_v16 = vmax.f32 %v342_v14, 0.0 }
 0x135   : > { %442 = vrot.lane.b32.xlu1 %v1303_v13, %s1113_s20  ;;  %420 = vrot.lane.b32.xlu0 %v1303_v13, %s1114_s26 }
 0x139   : > { %348 = vrot.lane.b32.xlu1 %v1303_v13, %s1115_s28  ;;  %444 = vrot.lane.b32.xlu0 %v1307_v16, %s1113_s20  ;;  %s905_s20 = sshll.u32 %s1178_s25, 7  ;;  %s1121_s25 = smov [#allocation7]  }
 0x13a   : > { %s1040_s14 = sshll.u32 %s1121_s25, 4  ;;  %s1041_s14 = int_to_ptr.vmem [resolvable:$false] %s1040_s14 }
 0x13b   : > { %s1042_s13 = scalar_lea.vmem %s1041_s14, 256 }
 0x13d   : > { %371 = vrot.lane.b32.xlu1 %v1303_v13, %s1116_s11  ;;  %350 = vrot.lane.b32.xlu0 %v1307_v16, %s1115_s28 }
 0x141   : > { %572 = vrot.lane.b32.xlu1 %v1303_v13, %s1117_s29  ;;  %373 = vrot.lane.b32.xlu0 %v1307_v16, %s1116_s11 }
 0x145   : > { %422 = vrot.lane.b32.xlu1 %v1307_v16, %s1114_s26  ;;  %574 = vrot.lane.b32.xlu0 %v1307_v16, %s1117_s29  ;;  %s272_s26 = scalar_lea.vmem [#allocation7], %s879_s19 }
 0x146   : > { %s790_s28 = sshll.u32 %s272_s26, 4  ;;  %s1431_s28 = int_to_ptr.vmem [resolvable:$true] %s790_s28 }
 0x147   : > { %p1043_p4 = scmp.lt.s32.totalorder %s1431_s28, %s1041_s14 }
 0x149   : > { %594 = vrot.lane.b32.xlu1 %v1303_v13, %s1118_s10  ;;  %596 = vrot.lane.b32.xlu0 %v1307_v16, %s1118_s10  ;;  %s1429_s10 = scalar_lea.hbm %s1477_s6, %s905_s20 }
 0x14d   : > { %393 = vrot.lane.b32.xlu1 %v1303_v13, %s1119_s9  ;;  %395 = vrot.lane.b32.xlu0 %v1307_v16, %s1119_s9  ;;  %s776_s9 = scalar_lea.sflag [#allocation4], %s270_s18 }
 0x151   : > { %616 = vrot.lane.b32.xlu1 %v1303_v13, %s1120_s12  ;;  %618 = vrot.lane.b32.xlu0 %v1307_v16, %s1120_s12  ;;  %s1036_s12 = scalar_lea.vmem %s1431_s28, 128 }
 0x152   : > { %p1037_p12 = scmp.ne.s32.totalorder %s1431_s28, %s1036_s12  ;;  %p1044_p7 = scmp.lt.s32.totalorder %s1042_s13, %s1036_s12 }
 0x154   : > { %p1038_p2 = pnand %p1037_p12, %p1490_p1  ;;  %p1045_p8 = por %p1044_p7, %p1043_p4 }
 0x155   : > { %710 = vperm.xlu0 %977, %v282_v17   ;;  %698 = vperm.xlu1 %978, %v281_v18   ;;  %v406_v17 = vrot.slane %v885_v6, %v1334_v27  ;;  %v410_v18 = vrot.slane %v885_v6, %v1339_v29 }
 0x156   : > { %p1039_p3 = pneg %p1038_p2 }
 0x158   : > { %p1046_p11 = pnand %p1045_p8, %p1039_p3 }
 0x1a7   : > { %v443_v20 = vpop.permute.xlu1 %442  ;;  %v421_v21 = vpop.permute.xlu0 %420 }
 0x1ab   : > { %v349_v23 = vpop.permute.xlu1 %348  ;;  %v445_v24 = vpop.permute.xlu0 %444 }
 0x1ac   : > { %v447_v53 = vsel %vm446_vm4, %v443_v20, %v445_v24  ;;  %v448_v54 = vsel %vm446_vm4, %v445_v24, %v443_v20 }
 0x1ad   : > { %v462_v63 = vmul.f32 %v455_v40, %v447_v53  ;;  %v463_v2 = vmul.f32 %v459_v41, %v448_v54  ;;  %v469_v40 = vld [vmem:[#allocation2 + $0x4] sm:$0xf] }
 0x1af   : > { %v372_v30 = vpop.permute.xlu1 %371  ;;  %v351_v31 = vpop.permute.xlu0 %350  ;;  %v466_v20 = vpack.c.bf16 %v462_v63, %v462_v63 }
 0x1b0   : > { %v355_v38 = vsel %vm354_vm2, %v349_v23, %v351_v31  ;;  %v356_v39 = vsel %vm354_vm2, %v351_v31, %v349_v23 }
 0x1b1   : > { %v369_v48 = vmul.f32 %v362_v33, %v356_v39  ;;  %v370_v49 = vmul.f32 %v366_v34, %v355_v38  ;;  %v633_v34 = vrot.slane %v894_v19, %v1339_v29  ;;  %v476_v37 = vsel %vm474_vm9, %v466_v20, 0 }
 0x1b3   : > { %v573_v42 = vpop.permute.xlu1 %572  ;;  %v374_v43 = vpop.permute.xlu0 %373 }
 0x1b4   : > { %v376_v44 = vsel %vm375_vm3, %v372_v30, %v374_v43  ;;  %v377_v45 = vsel %vm375_vm3, %v374_v43, %v372_v30  ;;  %v629_v30 = vrot.slane %v894_v19, %v1334_v27 }
 0x1b5   : > { %v391_v50 = vmul.f32 %v384_v35, %v377_v45  ;;  %v392_v51 = vmul.f32 %v388_v36, %v376_v44 }
 0x1b7   : > { %v415_v55 = vpack.c.bf16 %v391_v50, %v369_v48  ;;  %v423_v56 = vpop.permute.xlu1 %422  ;;  %v575_v58 = vpop.permute.xlu0 %574  ;;  %v416_v59 = vpack.c.bf16 %v392_v51, %v370_v49  ;;  %v419_v49 = vld [vmem:[#allocation2] sm:$0xf] }
 0x1b8   : > { %v425_v60 = vsel %vm424_vm5, %v421_v21, %v423_v56  ;;  %v426_v61 = vsel %vm424_vm5, %v423_v56, %v421_v21  ;;  %v578_v14 = vsel %vm576_vm6, %v575_v58, %v573_v42  ;;  %v577_v23 = vsel %vm576_vm6, %v573_v42, %v575_v58 }
 0x1b9   : > { %v440_v4 = vmul.f32 %v433_v46, %v426_v61  ;;  %531 = vmatprep.subr.bf16.mxu0 %v416_v59  ;;  %v441_v5 = vmul.f32 %v437_v47, %v425_v60  ;;  %v593_v24 = vmul.f32 %v589_v7, %v578_v14  ;;  %v592_v39 = vmul.f32 %v585_v22, %v577_v23 }
 0x1ba   : > { %532 = vmatpush1.bf16.msra.mxu0 %v415_v55 }
 0x1bb   : > { %v595_v8 = vpop.permute.xlu1 %594  ;;  %v597_v10 = vpop.permute.xlu0 %596  ;;  %v465_v11 = vpack.c.bf16 %v1307_v16, %v441_v5  ;;  %v464_v12 = vpack.c.bf16 %v1303_v13, %v440_v4  ;;  %v467_v16 = vpack.c.bf16 %v463_v2, %v463_v2 }
 0x1bc   : > { %v600_v15 = vsel %vm598_vm7, %v597_v10, %v595_v8  ;;  %v599_v13 = vsel %vm598_vm7, %v595_v8, %v597_v10 }
 0x1bd   : > { %v615_v21 = vmul.f32 %v611_v62, %v600_v15  ;;  %481 = vmatprep.subr.bf16.mxu1 %v465_v11  ;;  %v614_v31 = vmul.f32 %v607_v9, %v599_v13 }
 0x1be   : > { %482 = vmatpush1.bf16.msra.mxu1 %v464_v12 }
 0x1bf   : > { %v394_v26 = vpop.permute.xlu1 %393  ;;  %888 = vmatprep.subr.msk.bf16.mxu1 %vm474_vm9, %v467_v16  ;;  %v396_v28 = vpop.permute.xlu0 %395  ;;  %v639_v38 = vpack.c.bf16 %v615_v21, %v593_v24  ;;  %v638_v44 = vpack.c.bf16 %v614_v31, %v592_v39 }
 0x1c0   : > { %v398_v32 = vsel %vm397_vm8, %v394_v26, %v396_v28  ;;  %v399_v33 = vsel %vm397_vm8, %v396_v28, %v394_v26 }
 0x1c1   : > { %v413_v35 = vmul.f32 %v406_v17, %v399_v33  ;;  %v414_v36 = vmul.f32 %v410_v18, %v398_v32  ;;  %v705_v17 = vld [vmem:[#allocation5] sm:$0x3] }
 0x1c2   : > { %484 = vmatpush1.bf16.msra.mxu1 %v476_v37 }
 0x1c3   : > { %v417_v41 = vpack.c.bf16 %v413_v35, %v413_v35  ;;  %v418_v27 = vpack.c.bf16 %v414_v36, %v414_v36  ;;  %v617_v42 = vpop.permute.xlu1 %616  ;;  %653 = vmatprep.subr.bf16.mxu1 %v639_v38  ;;  %v619_v43 = vpop.permute.xlu0 %618 }
 0x1c4   : > { %v621_v45 = vsel %vm620_vm10, %v617_v42, %v619_v43  ;;  %v622_v29 = vsel %vm620_vm10, %v619_v43, %v617_v42 }
 0x1c5   : > { %v636_v46 = vmul.f32 %v629_v30, %v621_v45  ;;  %v637_v47 = vmul.f32 %v633_v34, %v622_v29  ;;  %889 = vmatmul.mubr.msk.bf16.vlgmr.msra.gmra.mrb[0].mxu1 %vm470_vm11, %v469_v40  ;;  %890 = vmatprep.subr.msk.bf16.mxu0 %vm474_vm9, %v418_v27  ;;  %v526_v48 = vsel %vm474_vm9, %v417_v41, 0 }
 0x1c6   : > { %534 = vmatpush1.bf16.msra.mxu0 %v526_v48  ;;  %654 = vmatpush1.bf16.msra.mxu1 %v638_v44 }
 0x1c7   : > { %v640_v50 = vpack.c.bf16 %v636_v46, %v636_v46  ;;  %v641_v51 = vpack.c.bf16 %v637_v47, %v637_v47  ;;  %685 = vmatprep.mubr.bf16.mxu1 %v1112_v0 }
 0x1c9   : > { %891 = vmatmul.mubr.msk.bf16.vlgmr.msra.gmra.mrb[4].mxu0 %vm470_vm11, %v419_v49  ;;  %895 = vmatprep.subr.msk.bf16.mxu1 %vm474_vm9, %v641_v51  ;;  %v648_v25 = vsel %vm474_vm9, %v640_v50, 0 }
 0x1ca   : > { %656 = vmatpush1.bf16.msra.mxu1 %v648_v25  ;;  %755 = vmatprep.mubr.bf16.mxu0 %v1112_v0 }
 0x1cd   : > { %896 = vmatmul.mubr.msk.bf16.vlgmr.msra.gmra.mrb[4].mxu1 %vm470_vm11, %v643_v52 }
 0x1d4   : > { %v699_v2 = vpop.permute.xlu1 %698  ;;  %v711_v18 = vpop.permute.xlu0 %710 }
 0x298   : > { %v515_v53 = vpop.f32.mrb[0].mxu1 }
 0x299   : > { %v517_v54 = vpop.f32.mrb[1].mxu1 }
 0x29a   : > { %v519_v55 = vpop.f32.mrb[2].mxu1 }
 0x29b   : > { %v520_v56 = vpop.f32.mrb[3].mxu1 }
 0x29c   : > { %v565_v57 = vpop.f32.mrb[4].mxu0 }
 0x29d   : > { %v566_v58 = vadd.f32 %v565_v57, %v515_v53  ;;  %v567_v59 = vpop.f32.mrb[5].mxu0 }
 0x29e   : > { %v568_v60 = vadd.f32 %v567_v59, %v517_v54  ;;  %v569_v61 = vpop.f32.mrb[6].mxu0 }
 0x29f   : > { %v570_v62 = vpop.f32.mrb[7].mxu0 }
 0x2a0   : > { %v687_v63 = vpop.f32.mrb[4].mxu1 }
 0x2a1   : > { %v694_v4 = vadd.f32 %v687_v63, %v566_v58  ;;  %v689_v5 = vpop.f32.mrb[5].mxu1 }
 0x2a2   : > { %v695_v6 = vadd.f32 %v689_v5, %v568_v60  ;;  %v691_v7 = vpop.f32.mrb[6].mxu1 }
 0x2a3   : > { %v701_v0 = vadd.f32 %v699_v2, %v694_v4  ;;  %v692_v8 = vpop.f32.mrb[7].mxu1 }
 0x2a4   : > { %v702_v9 = vadd.f32 %v699_v2, %v695_v6 }
 0x2a5   : > { %v703_v10 = vmax.f32 %v701_v0, 0.0 }
 0x2a6   : > { %v704_v11 = vmax.f32 %v702_v9, 0.0 }
 0x2a7   : > { %v706_v12 = vpack.c.bf16 %v703_v10, %v703_v10 }
 0x2a8   : > { %v707_v14 = vpack.c.bf16 %v704_v11, %v704_v11 }
 0x2a9   : > { %v718_v15 = vsel %vm474_vm9, %v706_v12, 0 }
 0x2aa   : > { %897 = vmatprep.subr.msk.bf16.mxu0 %vm474_vm9, %v707_v14 }
 0x2ab   : > { %724 = vmatpush1.bf16.msra.mxu0 %v718_v15 }
 0x2ae   : > { %898 = vmatmul.mubr.msk.bf16.vlgmr.msra.gmra.mrb[8].mxu0 %vm713_vm12, %v705_v17 }
 0x381   : > { %v757_v19 = vpop.f32.mrb[8].mxu0 }
 0x382   : > { %v758_v20 = vadd.f32 %v757_v19, %v711_v18  ;;  %v759_v16 = vpop.f32.mrb[9].mxu0 }
 0x383   : > { %v760_v13 = vadd.f32 %v759_v16, %v711_v18  ;;  %v761_v21 = vpop.f32.mrb[10].mxu0 }
 0x384   : > { %v764_v22 = vmax.f32 %v758_v20, 0.0  ;;  %v762_v23 = vpop.f32.mrb[11].mxu0 }
 0x385   : > { %v765_v24 = vmax.f32 %v760_v13, 0.0 }
 0x386   : > { %v766_v26 = vadd.f32 %v764_v22, %v1286_v1 }
 0x387   : > { %v767_v28 = vadd.f32 %v765_v24, %v1293_v3 }
 0x388   : > { %v768_v30 = vmax.f32 %v766_v26, 0.0 }
 0x389   : > { %v769_v31 = vmax.f32 %v767_v28, 0.0 }
 0x38b   : > { %v772_v32 = vcombine.low %v768_v30, %v769_v31 }
 0x38d   : > { %774 = vst [vmem:[%s272_s26] sm:$0xff] %v772_v32 }
 0x38e   : > { %1049 = shalt.err (!%p1046_p11)
}
 0x38f   : > { %s1050_s15 = scalar_lea.hbm %s1429_s10, 128  ;;  %s1054_s18 = scalar_lea.hbm %s1477_s6, 256 }
 0x390   : > { %p1051_p13 = scmp.ne.s32.totalorder %s1429_s10, %s1050_s15  ;;  %p1055_p6 = scmp.lt.u32.totalorder %s1429_s10, %s1477_s6 }
 0x391   : > { %p1056_p9 = scmp.lt.u32.totalorder %s1054_s18, %s1050_s15  ;;  %p1058_p12 = scmp.lt.u32.totalorder %s1050_s15, %s1429_s10 }
 0x392   : > { %p1052_p5 = pnand %p1051_p13, %p1490_p1 }
 0x393   : > { %p1057_p10 = por %p1056_p9, %p1055_p6 }
 0x394   : > { %p1053_p0 = pneg %p1052_p5 }
 0x395   : > { %p1059_p2 = por %p1058_p12, %p1057_p10 }
 0x397   : > { %p1060_p3 = pnand %p1059_p2, %p1053_p0 }
 0x399   : > { %1063 = shalt.err (!%p1060_p3)
}
 0x39a   : > { %914 = dma.vmem_to_hbm [thread:$0]  (%p1490_p1), %s1431_s28, 128, %s1429_s10, %s776_s9  }
 0x39b PF: > { %p931_p4 = scmp.ge.s32.totalorder %s1106_s24, 2  ;;  %s802_s26 = sand.u32 1, %s1094_s21  }
 0x39c   : > { %p1491_p7 = scmp.ne.s32.totalorder %s1482_s8, 0  ;;  %s803_s11 = scalar_lea.sflag [#allocation4], %s802_s26 }
 0x39e   : > { %p924_p8 = pnand %p931_p4, %p1491_p7 }
 0x3a0   : > { %1089 = dma.done.wait (!%p924_p8), %s803_s11, 128  }
 0x3a1   : > { %1091 = vsyncadd (!%p924_p8), %s803_s11, 4294967168  ;;  %p18_p11 = scmp.ge.s32.totalorder %s1182_s27, 4   ;;  %s1492_s21 = smov %s1098_s22 }
 0x3a2   : > { %s1493_s22 = smov %s1102_s23  ;;  %s1494_s23 = smov %s1193_s30 }
 0x3a3   : > { %s1495_s24 = smov %s1182_s27  ;;  %20 = sbr.rel (!%p18_p11) target bundleno = 5 (0x5), region = 97 }
 0x3aa   :  { %808 = vsyncpa [#allocation3], 1 }
 0x3ab   :  { %810 = vsyncpa [#allocation3 + $0x1], 1 }
 0x3ac   :  { %811 = vsyncpa [#allocation6], 1 }
 0x3ad   :  { %812 = vsyncpa [#allocation4], 1 }
 0x3ae   :  { %814 = vsyncpa [#allocation4 + $0x1], 1 }

</bundles_post_ra>
